<compile_context>
chip_gen: v6e
topology: v6e:2x2x1
jax: 0.10.0
libtpu: 0.0.40
codegen_flags: <defaults>
</compile_context>

<pallas_src>
import functools

import jax
import jax.numpy as jnp
from jax.experimental import pallas as pl
from jax.experimental.pallas import tpu as pltpu

LANE = 128              # vreg lane width
MAX_BLOCK_ROWS = 1024   # 1024 x 128 f32 = 512 KiB per input tile per grid step


def _ds_partials_kernel(*refs, num_layers, br, rbs, m_valid, needs_mask):
    """Accumulate per-sample partial sums for BCE + IoU of all layers.

    refs = (x_0, ..., x_{L-1}, t, out, acc)
      x_l : (br, LANE) logits block of layer l
      t   : (br, LANE) target block
      out : (3L+1,)    SMEM  -- per-(sample, split) [bce_l, inter_l, psum_l]*L + [gsum]
      acc : (3L+1, acc_rows, LANE) VMEM vreg-sized accumulators
    """
    x_refs = refs[:num_layers]
    t_ref = refs[num_layers]
    o_ref = refs[num_layers + 1]
    acc_ref = refs[num_layers + 2]
    acc_rows = acc_ref.shape[1]

    c = pl.program_id(1)    # reduction-range split (feeds v7x's 2nd TensorCore)
    rb = pl.program_id(2)   # row block within the split

    @pl.when(rb == 0)
    def _():
        acc_ref[...] = jnp.zeros_like(acc_ref)

    if needs_mask:
        # Ragged tail handled in-kernel (no host-side pad of full tensors):
        # element valid iff its flattened per-sample index < m_valid.  Also
        # neutralizes any garbage (NaN/Inf) read from partial / OOB blocks.
        sub = jax.lax.broadcasted_iota(jnp.int32, (br, LANE), 0)
        lane = jax.lax.broadcasted_iota(jnp.int32, (br, LANE), 1)
        flat = ((c * rbs + rb) * br + sub) * LANE + lane
        valid = flat < m_valid
        mask = lambda v: jnp.where(valid, v, 0.0)
    else:
        mask = lambda v: v

    def to_acc(v):
        # (br, LANE) -> (acc_rows, LANE): pure vreg adds (no XLU), so the
        # read-modify-write on the accumulator touches a single vreg per partial.
        if br == acc_rows:
            return v
        return v.reshape(br // acc_rows, acc_rows, LANE).sum(axis=0)

    t = mask(t_ref[...].astype(jnp.float32))
    acc_ref[3 * num_layers] += to_acc(t)                # sum(g), layer-independent

    for l in range(num_layers):
        x = x_refs[l][...].astype(jnp.float32)
        e = jnp.exp(-jnp.abs(x))                                   # EUP
        bce = mask(jnp.maximum(x, 0.0) - x * t + jnp.log1p(e))     # stable BCE-with-logits
        r = pl.reciprocal(1.0 + e, approx=True)                    # EUP vrcp (approx ok: feeds sums)
        p = mask(jnp.where(x >= 0.0, r, e * r))                    # stable sigmoid, reuses e
        acc_ref[3 * l + 0] += to_acc(bce)
        acc_ref[3 * l + 1] += to_acc(p * t)
        acc_ref[3 * l + 2] += to_acc(p)

    @pl.when(rb == pl.num_programs(2) - 1)
    def _():
        # One tiny cross-lane reduce per partial (single vreg each), to SMEM.
        for i in range(3 * num_layers + 1):
            o_ref[i] = jnp.sum(acc_ref[i])


def deep_supervision_loss(pred_logits_list, target_mask, weights=None,
                          epsilon=1e-6, block_rows=None):
    """JAX/Pallas equivalent of DeepSupervisionLoss.forward."""
    num_layers = len(pred_logits_list)
    assert num_layers > 0
    if weights is None:
        weights = ([0.2, 0.3, 0.5] if num_layers == 3
                   else [1.0 / num_layers] * num_layers)
    assert len(weights) == num_layers

    shape = target_mask.shape
    for x in pred_logits_list:
        assert x.shape == shape, (
            f"Input and target shapes must match. Got {x.shape} and {shape}")

    n = int(shape[0])
    m = 1
    for d in shape[1:]:
        m *= int(d)

    # Lane-dense view (n, rows, 128).  Only when m is not a multiple of 128 do
    # we pad by <128 elements/sample so the view exists; the pad *values* are
    # irrelevant since the ragged tail is masked in-kernel.
    m_lane = pl.cdiv(m, LANE) * LANE
    lane_pad = m_lane - m
    rows = m_lane // LANE

    max_rows = MAX_BLOCK_ROWS if block_rows is None else int(block_rows)
    if rows >= 8:
        br = min(rows, max(max_rows, 8))
        br -= br % 8                     # multiple of 8 -> vreg-aligned sublane reduce
    else:
        br = rows                        # tiny sample: block spans the full row extent
    acc_rows = 8 if br >= 8 else br
    row_blocks = pl.cdiv(rows, br)

    # v7x has 2 TensorCores; when the batch axis alone cannot feed both (N==1),
    # split the reduction (row-block) range into two parallel halves with
    # per-half partial outputs, combined below.  No-op cost on 1-TC chips.
    splits = 2 if (n == 1 and row_blocks >= 2) else 1
    rbs = pl.cdiv(row_blocks, splits)

    covered = splits * rbs * br * LANE
    needs_mask = covered != m

    def _prep(a):
        a2 = a.reshape(n, m)                       # contiguous reshape (no copy)
        if lane_pad:
            a2 = jnp.pad(a2, ((0, 0), (0, lane_pad)))   # <128 elems/sample, masked
        return a2.reshape(n, rows, LANE)

    xs = [_prep(x) for x in pred_logits_list]
    t = _prep(target_mask)

    num_partial = 3 * num_layers + 1
    grid = (n, splits, rbs)
    in_blk = pl.BlockSpec((None, br, LANE), lambda b, c, r: (b, c * rbs + r, 0))

    # Deliberate scoped-VMEM budget: double-buffered input tiles + accumulator.
    vmem_need = (2 * (num_layers + 1) * br * LANE * 4
                 + num_partial * acc_rows * LANE * 4)
    vmem_limit = int(min(max(4 * vmem_need, 16 * 1024 * 1024), 64 * 1024 * 1024))

    partials = pl.pallas_call(
        functools.partial(_ds_partials_kernel, num_layers=num_layers, br=br,
                          rbs=rbs, m_valid=m, needs_mask=needs_mask),
        out_shape=jax.ShapeDtypeStruct((n, splits, num_partial), jnp.float32),
        grid_spec=pltpu.PrefetchScalarGridSpec(
            num_scalar_prefetch=0,
            grid=grid,
            in_specs=[in_blk] * (num_layers + 1),
            out_specs=pl.BlockSpec((None, None, num_partial),
                                   lambda b, c, r: (b, c, 0),
                                   memory_space=pltpu.SMEM),
            scratch_shapes=[pltpu.VMEM((num_partial, acc_rows, LANE), jnp.float32)],
        ),
        compiler_params=pltpu.CompilerParams(
            dimension_semantics=("parallel", "parallel", "arbitrary"),
            vmem_limit_bytes=vmem_limit),
    )(*xs, t)

    # Tiny final math on the per-sample partials (plain JAX).
    partials = partials.sum(axis=1)          # combine the core-split halves
    n_elems = jnp.float32(n * m)             # divisor uses the *unpadded* count
    gsum = partials[:, 3 * num_layers]
    total = jnp.float32(0.0)
    for l in range(num_layers):
        bce_l = jnp.sum(partials[:, 3 * l + 0]) / n_elems
        inter = partials[:, 3 * l + 1]
        psum = partials[:, 3 * l + 2]
        union = psum + gsum - inter
        iou = (inter + epsilon) / (union + epsilon)
        iou_loss_l = 1.0 - jnp.mean(iou)
        total = total + jnp.float32(weights[l]) * (iou_loss_l + bce_l)
    return total / num_layers


def _reference(pred_logits_list, target_mask, weights=None, epsilon=1e-6):
    num_layers = len(pred_logits_list)
    if weights is None:
        weights = ([0.2, 0.3, 0.5] if num_layers == 3
                   else [1.0 / num_layers] * num_layers)
    t = target_mask.astype(jnp.float32)
    total = jnp.float32(0.0)
    for i, logits in enumerate(pred_logits_list):
        x = logits.astype(jnp.float32)
        bce = jnp.mean(jnp.maximum(x, 0.0) - x * t
                       + jnp.log1p(jnp.exp(-jnp.abs(x))))
        p = jax.nn.sigmoid(x)
        dims = tuple(range(1, x.ndim))
        inter = jnp.sum(p * t, axis=dims)
        union = jnp.sum(p, axis=dims) + jnp.sum(t, axis=dims) - inter
        iou = (inter + epsilon) / (union + epsilon)
        iou_loss = 1.0 - jnp.mean(iou)
        total = total + weights[i] * (iou_loss + bce)
    return total / num_layers


if __name__ == "__main__":
    # Tolerance loosened vs. exact math because the sigmoid uses the approx
    # EUP reciprocal (a few ULPs on p, which only feeds the IoU sums).
    TOL = 5e-4

    # Case 1: lane-aligned shapes typical for a deep-supervised seg loss, N=2.
    key = jax.random.PRNGKey(0)
    k = jax.random.split(key, 4)
    shape = (2, 4, 16, 16)                      # (N, C, H, W), m = 1024
    preds = [jax.random.normal(k[i], shape, dtype=jnp.float32) for i in range(3)]
    tgt = (jax.random.uniform(k[3], shape) > 0.5).astype(jnp.float32)
    loss = jax.block_until_ready(deep_supervision_loss(preds, tgt))
    ref = jax.block_until_ready(_reference(preds, tgt))
    assert jnp.allclose(loss, ref, atol=TOL, rtol=TOL), (loss, ref)

    # Case 2: ragged size (m % 128 != 0), N=1, small block -> exercises the
    # in-kernel tail mask, multi-block accumulation, and the 2-way
    # reduction-range split (v7x second TensorCore path).
    k2 = jax.random.split(jax.random.PRNGKey(0), 3)
    shape2 = (1, 1, 33, 130)                    # m = 4290
    preds2 = [jax.random.normal(k2[i], shape2, dtype=jnp.float32) for i in range(2)]
    tgt2 = (jax.random.uniform(k2[2], shape2) > 0.5).astype(jnp.float32)
    loss2 = jax.block_until_ready(deep_supervision_loss(preds2, tgt2, block_rows=8))
    ref2 = jax.block_until_ready(_reference(preds2, tgt2))
    assert jnp.allclose(loss2, ref2, atol=TOL, rtol=TOL), (loss2, ref2)

    print("KERNEL_OK")
</pallas_src>

<mosaic_0001>
module attributes {stable_mosaic.version = 11 : i64} {
  func.func @_ds_partials_kernel(%arg0: i32, %arg1: i32, %arg2: i32, %arg3: memref<1x8x128xf32, #tpu.memory_space<vmem>>, %arg4: memref<1x8x128xf32, #tpu.memory_space<vmem>>, %arg5: memref<1x8x128xf32, #tpu.memory_space<vmem>>, %arg6: memref<1x8x128xf32, #tpu.memory_space<vmem>>, %arg7: memref<1x1x10xf32, #tpu.memory_space<smem>>, %arg8: memref<10x8x128xf32, #tpu.memory_space<vmem>>) attributes {dimension_semantics = [#tpu.dimension_semantics<parallel>, #tpu.dimension_semantics<parallel>, #tpu.dimension_semantics<arbitrary>], iteration_bounds = array<i64: 2, 1, 1>, scalar_prefetch = 0 : i64, scratch_operands = 1 : i64, tpu.core_type = #tpu.core_type<tc>, window_params = [{transform_indices = @transform_0, window_bounds = array<i64: 1, 8, 128>}, {transform_indices = @transform_1, window_bounds = array<i64: 1, 8, 128>}, {transform_indices = @transform_2, window_bounds = array<i64: 1, 8, 128>}, {transform_indices = @transform_3, window_bounds = array<i64: 1, 8, 128>}, {transform_indices = @transform_4, window_bounds = array<i64: 1, 1, 10>}]} {
    %c0_i32 = arith.constant 0 : i32
    %0 = arith.cmpi eq, %arg2, %c0_i32 : i32
    %1 = arith.extui %0 : i1 to i32
    %c0_i32_0 = arith.constant 0 : i32
    %2 = arith.cmpi ne, %1, %c0_i32_0 : i32
    scf.if %2 {
      %cst_76 = arith.constant 0.000000e+00 : f32
      %128 = vector.broadcast %cst_76 : f32 to vector<10x8x128xf32>
      %c0_77 = arith.constant 0 : index
      %c0_78 = arith.constant 0 : index
      %c0_79 = arith.constant 0 : index
      %129 = vector.load %arg8[%c0_77, %c0_78, %c0_79] : memref<10x8x128xf32, #tpu.memory_space<vmem>>, vector<10x8x128xf32>
      tpu.vector_store %arg8[%c0_77, %c0_78, %c0_79], %128 {strides = array<i32>} : memref<10x8x128xf32, #tpu.memory_space<vmem>>, vector<10x8x128xf32>,
    } else {
    }
    %c0 = arith.constant 0 : index
    %c0_1 = arith.constant 0 : index
    %c0_2 = arith.constant 0 : index
    %3 = vector.load %arg6[%c0, %c0_1, %c0_2] : memref<1x8x128xf32, #tpu.memory_space<vmem>>, vector<1x8x128xf32>
    %4 = vector.shape_cast %3 : vector<1x8x128xf32> to vector<8x128xf32>
    %c9 = arith.constant 9 : index
    %c0_3 = arith.constant 0 : index
    %c0_4 = arith.constant 0 : index
    %5 = vector.load %arg8[%c9, %c0_3, %c0_4] : memref<10x8x128xf32, #tpu.memory_space<vmem>>, vector<1x8x128xf32>
    %6 = vector.shape_cast %5 : vector<1x8x128xf32> to vector<8x128xf32>
    %7 = arith.addf %6, %4 : vector<8x128xf32>
    %c9_5 = arith.constant 9 : index
    %c0_6 = arith.constant 0 : index
    %c0_7 = arith.constant 0 : index
    %8 = vector.load %arg8[%c9_5, %c0_6, %c0_7] : memref<10x8x128xf32, #tpu.memory_space<vmem>>, vector<1x8x128xf32>
    %9 = vector.shape_cast %8 : vector<1x8x128xf32> to vector<8x128xf32>
    %10 = vector.shape_cast %7 : vector<8x128xf32> to vector<1x8x128xf32>
    tpu.vector_store %arg8[%c9_5, %c0_6, %c0_7], %10 {strides = array<i32>} : memref<10x8x128xf32, #tpu.memory_space<vmem>>, vector<1x8x128xf32>,
    %c0_8 = arith.constant 0 : index
    %c0_9 = arith.constant 0 : index
    %c0_10 = arith.constant 0 : index
    %11 = vector.load %arg3[%c0_8, %c0_9, %c0_10] : memref<1x8x128xf32, #tpu.memory_space<vmem>>, vector<1x8x128xf32>
    %12 = vector.shape_cast %11 : vector<1x8x128xf32> to vector<8x128xf32>
    %13 = math.absf %12 : vector<8x128xf32>
    %cst = arith.constant 0.000000e+00 : f32
    %14 = vector.broadcast %cst : f32 to vector<8x128xf32>
    %15 = arith.subf %14, %13 : vector<8x128xf32>
    %16 = math.exp %15 : vector<8x128xf32>
    %cst_11 = arith.constant 0.000000e+00 : f32
    %17 = vector.broadcast %cst_11 : f32 to vector<8x128xf32>
    %18 = arith.maximumf %12, %17 : vector<8x128xf32>
    %19 = arith.mulf %12, %4 : vector<8x128xf32>
    %20 = arith.subf %18, %19 : vector<8x128xf32>
    %21 = math.log1p %16 : vector<8x128xf32>
    %22 = arith.addf %20, %21 : vector<8x128xf32>
    %cst_12 = arith.constant 1.000000e+00 : f32
    %23 = vector.broadcast %cst_12 : f32 to vector<8x128xf32>
    %24 = arith.addf %23, %16 : vector<8x128xf32>
    %25 = tpu.reciprocal %24 {approx = true} : vector<8x128xf32> -> vector<8x128xf32>
    %cst_13 = arith.constant 0.000000e+00 : f32
    %26 = vector.broadcast %cst_13 : f32 to vector<8x128xf32>
    %27 = arith.cmpf oge, %12, %26 : vector<8x128xf32>
    %28 = arith.mulf %16, %25 : vector<8x128xf32>
    %29 = arith.select %27, %25, %28 : vector<8x128xi1>, vector<8x128xf32>
    %c0_14 = arith.constant 0 : index
    %c0_15 = arith.constant 0 : index
    %c0_16 = arith.constant 0 : index
    %30 = vector.load %arg8[%c0_14, %c0_15, %c0_16] : memref<10x8x128xf32, #tpu.memory_space<vmem>>, vector<1x8x128xf32>
    %31 = vector.shape_cast %30 : vector<1x8x128xf32> to vector<8x128xf32>
    %32 = arith.addf %31, %22 : vector<8x128xf32>
    %c0_17 = arith.constant 0 : index
    %c0_18 = arith.constant 0 : index
    %c0_19 = arith.constant 0 : index
    %33 = vector.load %arg8[%c0_17, %c0_18, %c0_19] : memref<10x8x128xf32, #tpu.memory_space<vmem>>, vector<1x8x128xf32>
    %34 = vector.shape_cast %33 : vector<1x8x128xf32> to vector<8x128xf32>
    %35 = vector.shape_cast %32 : vector<8x128xf32> to vector<1x8x128xf32>
    tpu.vector_store %arg8[%c0_17, %c0_18, %c0_19], %35 {strides = array<i32>} : memref<10x8x128xf32, #tpu.memory_space<vmem>>, vector<1x8x128xf32>,
    %c1 = arith.constant 1 : index
    %c0_20 = arith.constant 0 : index
    %c0_21 = arith.constant 0 : index
    %36 = vector.load %arg8[%c1, %c0_20, %c0_21] : memref<10x8x128xf32, #tpu.memory_space<vmem>>, vector<1x8x128xf32>
    %37 = vector.shape_cast %36 : vector<1x8x128xf32> to vector<8x128xf32>
    %38 = arith.mulf %29, %4 : vector<8x128xf32>
    %39 = arith.addf %37, %38 : vector<8x128xf32>
    %c1_22 = arith.constant 1 : index
    %c0_23 = arith.constant 0 : index
    %c0_24 = arith.constant 0 : index
    %40 = vector.load %arg8[%c1_22, %c0_23, %c0_24] : memref<10x8x128xf32, #tpu.memory_space<vmem>>, vector<1x8x128xf32>
    %41 = vector.shape_cast %40 : vector<1x8x128xf32> to vector<8x128xf32>
    %42 = vector.shape_cast %39 : vector<8x128xf32> to vector<1x8x128xf32>
    tpu.vector_store %arg8[%c1_22, %c0_23, %c0_24], %42 {strides = array<i32>} : memref<10x8x128xf32, #tpu.memory_space<vmem>>, vector<1x8x128xf32>,
    %c2 = arith.constant 2 : index
    %c0_25 = arith.constant 0 : index
    %c0_26 = arith.constant 0 : index
    %43 = vector.load %arg8[%c2, %c0_25, %c0_26] : memref<10x8x128xf32, #tpu.memory_space<vmem>>, vector<1x8x128xf32>
    %44 = vector.shape_cast %43 : vector<1x8x128xf32> to vector<8x128xf32>
    %45 = arith.addf %44, %29 : vector<8x128xf32>
    %c2_27 = arith.constant 2 : index
    %c0_28 = arith.constant 0 : index
    %c0_29 = arith.constant 0 : index
    %46 = vector.load %arg8[%c2_27, %c0_28, %c0_29] : memref<10x8x128xf32, #tpu.memory_space<vmem>>, vector<1x8x128xf32>
    %47 = vector.shape_cast %46 : vector<1x8x128xf32> to vector<8x128xf32>
    %48 = vector.shape_cast %45 : vector<8x128xf32> to vector<1x8x128xf32>
    tpu.vector_store %arg8[%c2_27, %c0_28, %c0_29], %48 {strides = array<i32>} : memref<10x8x128xf32, #tpu.memory_space<vmem>>, vector<1x8x128xf32>,
    %c0_30 = arith.constant 0 : index
    %c0_31 = arith.constant 0 : index
    %c0_32 = arith.constant 0 : index
    %49 = vector.load %arg4[%c0_30, %c0_31, %c0_32] : memref<1x8x128xf32, #tpu.memory_space<vmem>>, vector<1x8x128xf32>
    %50 = vector.shape_cast %49 : vector<1x8x128xf32> to vector<8x128xf32>
    %51 = math.absf %50 : vector<8x128xf32>
    %cst_33 = arith.constant 0.000000e+00 : f32
    %52 = vector.broadcast %cst_33 : f32 to vector<8x128xf32>
    %53 = arith.subf %52, %51 : vector<8x128xf32>
    %54 = math.exp %53 : vector<8x128xf32>
    %cst_34 = arith.constant 0.000000e+00 : f32
    %55 = vector.broadcast %cst_34 : f32 to vector<8x128xf32>
    %56 = arith.maximumf %50, %55 : vector<8x128xf32>
    %57 = arith.mulf %50, %4 : vector<8x128xf32>
    %58 = arith.subf %56, %57 : vector<8x128xf32>
    %59 = math.log1p %54 : vector<8x128xf32>
    %60 = arith.addf %58, %59 : vector<8x128xf32>
    %cst_35 = arith.constant 1.000000e+00 : f32
    %61 = vector.broadcast %cst_35 : f32 to vector<8x128xf32>
    %62 = arith.addf %61, %54 : vector<8x128xf32>
    %63 = tpu.reciprocal %62 {approx = true} : vector<8x128xf32> -> vector<8x128xf32>
    %cst_36 = arith.constant 0.000000e+00 : f32
    %64 = vector.broadcast %cst_36 : f32 to vector<8x128xf32>
    %65 = arith.cmpf oge, %50, %64 : vector<8x128xf32>
    %66 = arith.mulf %54, %63 : vector<8x128xf32>
    %67 = arith.select %65, %63, %66 : vector<8x128xi1>, vector<8x128xf32>
    %c3 = arith.constant 3 : index
    %c0_37 = arith.constant 0 : index
    %c0_38 = arith.constant 0 : index
    %68 = vector.load %arg8[%c3, %c0_37, %c0_38] : memref<10x8x128xf32, #tpu.memory_space<vmem>>, vector<1x8x128xf32>
    %69 = vector.shape_cast %68 : vector<1x8x128xf32> to vector<8x128xf32>
    %70 = arith.addf %69, %60 : vector<8x128xf32>
    %c3_39 = arith.constant 3 : index
    %c0_40 = arith.constant 0 : index
    %c0_41 = arith.constant 0 : index
    %71 = vector.load %arg8[%c3_39, %c0_40, %c0_41] : memref<10x8x128xf32, #tpu.memory_space<vmem>>, vector<1x8x128xf32>
    %72 = vector.shape_cast %71 : vector<1x8x128xf32> to vector<8x128xf32>
    %73 = vector.shape_cast %70 : vector<8x128xf32> to vector<1x8x128xf32>
    tpu.vector_store %arg8[%c3_39, %c0_40, %c0_41], %73 {strides = array<i32>} : memref<10x8x128xf32, #tpu.memory_space<vmem>>, vector<1x8x128xf32>,
    %c4 = arith.constant 4 : index
    %c0_42 = arith.constant 0 : index
    %c0_43 = arith.constant 0 : index
    %74 = vector.load %arg8[%c4, %c0_42, %c0_43] : memref<10x8x128xf32, #tpu.memory_space<vmem>>, vector<1x8x128xf32>
    %75 = vector.shape_cast %74 : vector<1x8x128xf32> to vector<8x128xf32>
    %76 = arith.mulf %67, %4 : vector<8x128xf32>
    %77 = arith.addf %75, %76 : vector<8x128xf32>
    %c4_44 = arith.constant 4 : index
    %c0_45 = arith.constant 0 : index
    %c0_46 = arith.constant 0 : index
    %78 = vector.load %arg8[%c4_44, %c0_45, %c0_46] : memref<10x8x128xf32, #tpu.memory_space<vmem>>, vector<1x8x128xf32>
    %79 = vector.shape_cast %78 : vector<1x8x128xf32> to vector<8x128xf32>
    %80 = vector.shape_cast %77 : vector<8x128xf32> to vector<1x8x128xf32>
    tpu.vector_store %arg8[%c4_44, %c0_45, %c0_46], %80 {strides = array<i32>} : memref<10x8x128xf32, #tpu.memory_space<vmem>>, vector<1x8x128xf32>,
    %c5 = arith.constant 5 : index
    %c0_47 = arith.constant 0 : index
    %c0_48 = arith.constant 0 : index
    %81 = vector.load %arg8[%c5, %c0_47, %c0_48] : memref<10x8x128xf32, #tpu.memory_space<vmem>>, vector<1x8x128xf32>
    %82 = vector.shape_cast %81 : vector<1x8x128xf32> to vector<8x128xf32>
    %83 = arith.addf %82, %67 : vector<8x128xf32>
    %c5_49 = arith.constant 5 : index
    %c0_50 = arith.constant 0 : index
    %c0_51 = arith.constant 0 : index
    %84 = vector.load %arg8[%c5_49, %c0_50, %c0_51] : memref<10x8x128xf32, #tpu.memory_space<vmem>>, vector<1x8x128xf32>
    %85 = vector.shape_cast %84 : vector<1x8x128xf32> to vector<8x128xf32>
    %86 = vector.shape_cast %83 : vector<8x128xf32> to vector<1x8x128xf32>
    tpu.vector_store %arg8[%c5_49, %c0_50, %c0_51], %86 {strides = array<i32>} : memref<10x8x128xf32, #tpu.memory_space<vmem>>, vector<1x8x128xf32>,
    %c0_52 = arith.constant 0 : index
    %c0_53 = arith.constant 0 : index
    %c0_54 = arith.constant 0 : index
    %87 = vector.load %arg5[%c0_52, %c0_53, %c0_54] : memref<1x8x128xf32, #tpu.memory_space<vmem>>, vector<1x8x128xf32>
    %88 = vector.shape_cast %87 : vector<1x8x128xf32> to vector<8x128xf32>
    %89 = math.absf %88 : vector<8x128xf32>
    %cst_55 = arith.constant 0.000000e+00 : f32
    %90 = vector.broadcast %cst_55 : f32 to vector<8x128xf32>
    %91 = arith.subf %90, %89 : vector<8x128xf32>
    %92 = math.exp %91 : vector<8x128xf32>
    %cst_56 = arith.constant 0.000000e+00 : f32
    %93 = vector.broadcast %cst_56 : f32 to vector<8x128xf32>
    %94 = arith.maximumf %88, %93 : vector<8x128xf32>
    %95 = arith.mulf %88, %4 : vector<8x128xf32>
    %96 = arith.subf %94, %95 : vector<8x128xf32>
    %97 = math.log1p %92 : vector<8x128xf32>
    %98 = arith.addf %96, %97 : vector<8x128xf32>
    %cst_57 = arith.constant 1.000000e+00 : f32
    %99 = vector.broadcast %cst_57 : f32 to vector<8x128xf32>
    %100 = arith.addf %99, %92 : vector<8x128xf32>
    %101 = tpu.reciprocal %100 {approx = true} : vector<8x128xf32> -> vector<8x128xf32>
    %cst_58 = arith.constant 0.000000e+00 : f32
    %102 = vector.broadcast %cst_58 : f32 to vector<8x128xf32>
    %103 = arith.cmpf oge, %88, %102 : vector<8x128xf32>
    %104 = arith.mulf %92, %101 : vector<8x128xf32>
    %105 = arith.select %103, %101, %104 : vector<8x128xi1>, vector<8x128xf32>
    %c6 = arith.constant 6 : index
    %c0_59 = arith.constant 0 : index
    %c0_60 = arith.constant 0 : index
    %106 = vector.load %arg8[%c6, %c0_59, %c0_60] : memref<10x8x128xf32, #tpu.memory_space<vmem>>, vector<1x8x128xf32>
    %107 = vector.shape_cast %106 : vector<1x8x128xf32> to vector<8x128xf32>
    %108 = arith.addf %107, %98 : vector<8x128xf32>
    %c6_61 = arith.constant 6 : index
    %c0_62 = arith.constant 0 : index
    %c0_63 = arith.constant 0 : index
    %109 = vector.load %arg8[%c6_61, %c0_62, %c0_63] : memref<10x8x128xf32, #tpu.memory_space<vmem>>, vector<1x8x128xf32>
    %110 = vector.shape_cast %109 : vector<1x8x128xf32> to vector<8x128xf32>
    %111 = vector.shape_cast %108 : vector<8x128xf32> to vector<1x8x128xf32>
    tpu.vector_store %arg8[%c6_61, %c0_62, %c0_63], %111 {strides = array<i32>} : memref<10x8x128xf32, #tpu.memory_space<vmem>>, vector<1x8x128xf32>,
    %c7 = arith.constant 7 : index
    %c0_64 = arith.constant 0 : index
    %c0_65 = arith.constant 0 : index
    %112 = vector.load %arg8[%c7, %c0_64, %c0_65] : memref<10x8x128xf32, #tpu.memory_space<vmem>>, vector<1x8x128xf32>
    %113 = vector.shape_cast %112 : vector<1x8x128xf32> to vector<8x128xf32>
    %114 = arith.mulf %105, %4 : vector<8x128xf32>
    %115 = arith.addf %113, %114 : vector<8x128xf32>
    %c7_66 = arith.constant 7 : index
    %c0_67 = arith.constant 0 : index
    %c0_68 = arith.constant 0 : index
    %116 = vector.load %arg8[%c7_66, %c0_67, %c0_68] : memref<10x8x128xf32, #tpu.memory_space<vmem>>, vector<1x8x128xf32>
    %117 = vector.shape_cast %116 : vector<1x8x128xf32> to vector<8x128xf32>
    %118 = vector.shape_cast %115 : vector<8x128xf32> to vector<1x8x128xf32>
    tpu.vector_store %arg8[%c7_66, %c0_67, %c0_68], %118 {strides = array<i32>} : memref<10x8x128xf32, #tpu.memory_space<vmem>>, vector<1x8x128xf32>,
    %c8 = arith.constant 8 : index
    %c0_69 = arith.constant 0 : index
    %c0_70 = arith.constant 0 : index
    %119 = vector.load %arg8[%c8, %c0_69, %c0_70] : memref<10x8x128xf32, #tpu.memory_space<vmem>>, vector<1x8x128xf32>
    %120 = vector.shape_cast %119 : vector<1x8x128xf32> to vector<8x128xf32>
    %121 = arith.addf %120, %105 : vector<8x128xf32>
    %c8_71 = arith.constant 8 : index
    %c0_72 = arith.constant 0 : index
    %c0_73 = arith.constant 0 : index
    %122 = vector.load %arg8[%c8_71, %c0_72, %c0_73] : memref<10x8x128xf32, #tpu.memory_space<vmem>>, vector<1x8x128xf32>
    %123 = vector.shape_cast %122 : vector<1x8x128xf32> to vector<8x128xf32>
    %124 = vector.shape_cast %121 : vector<8x128xf32> to vector<1x8x128xf32>
    tpu.vector_store %arg8[%c8_71, %c0_72, %c0_73], %124 {strides = array<i32>} : memref<10x8x128xf32, #tpu.memory_space<vmem>>, vector<1x8x128xf32>,
    %c0_i32_74 = arith.constant 0 : i32
    %125 = arith.cmpi eq, %arg2, %c0_i32_74 : i32
    %126 = arith.extui %125 : i1 to i32
    %c0_i32_75 = arith.constant 0 : i32
    %127 = arith.cmpi ne, %126, %c0_i32_75 : i32
    scf.if %127 {
      %c0_76 = arith.constant 0 : index
      %c0_77 = arith.constant 0 : index
      %c0_78 = arith.constant 0 : index
      %128 = vector.load %arg8[%c0_76, %c0_77, %c0_78] : memref<10x8x128xf32, #tpu.memory_space<vmem>>, vector<1x8x128xf32>
      %129 = vector.shape_cast %128 : vector<1x8x128xf32> to vector<8x128xf32>
      %130 = vector.shape_cast %129 : vector<8x128xf32> to vector<1x8x128xf32>
      %cst_79 = arith.constant dense<0.000000e+00> : vector<1xf32>
      %131 = vector.multi_reduction <add>, %130, %cst_79 [1, 2] : vector<1x8x128xf32> to vector<1xf32>
      %132 = vector.shape_cast %131 : vector<1xf32> to vector<1x1x1xf32>
      %133 = vector.extract %132[0, 0, 0] : f32 from vector<1x1x1xf32>
      %c0_80 = arith.constant 0 : index
      %c0_81 = arith.constant 0 : index
      %c0_82 = arith.constant 0 : index
      %134 = memref.load %arg7[%c0_80, %c0_81, %c0_82] : memref<1x1x10xf32, #tpu.memory_space<smem>>
      memref.store %133, %arg7[%c0_80, %c0_81, %c0_82] : memref<1x1x10xf32, #tpu.memory_space<smem>>
      %c1_83 = arith.constant 1 : index
      %c0_84 = arith.constant 0 : index
      %c0_85 = arith.constant 0 : index
      %135 = vector.load %arg8[%c1_83, %c0_84, %c0_85] : memref<10x8x128xf32, #tpu.memory_space<vmem>>, vector<1x8x128xf32>
      %136 = vector.shape_cast %135 : vector<1x8x128xf32> to vector<8x128xf32>
      %137 = vector.shape_cast %136 : vector<8x128xf32> to vector<1x8x128xf32>
      %cst_86 = arith.constant dense<0.000000e+00> : vector<1xf32>
      %138 = vector.multi_reduction <add>, %137, %cst_86 [1, 2] : vector<1x8x128xf32> to vector<1xf32>
      %139 = vector.shape_cast %138 : vector<1xf32> to vector<1x1x1xf32>
      %140 = vector.extract %139[0, 0, 0] : f32 from vector<1x1x1xf32>
      %c0_87 = arith.constant 0 : index
      %c0_88 = arith.constant 0 : index
      %c1_89 = arith.constant 1 : index
      %141 = memref.load %arg7[%c0_87, %c0_88, %c1_89] : memref<1x1x10xf32, #tpu.memory_space<smem>>
      memref.store %140, %arg7[%c0_87, %c0_88, %c1_89] : memref<1x1x10xf32, #tpu.memory_space<smem>>
      %c2_90 = arith.constant 2 : index
      %c0_91 = arith.constant 0 : index
      %c0_92 = arith.constant 0 : index
      %142 = vector.load %arg8[%c2_90, %c0_91, %c0_92] : memref<10x8x128xf32, #tpu.memory_space<vmem>>, vector<1x8x128xf32>
      %143 = vector.shape_cast %142 : vector<1x8x128xf32> to vector<8x128xf32>
      %144 = vector.shape_cast %143 : vector<8x128xf32> to vector<1x8x128xf32>
      %cst_93 = arith.constant dense<0.000000e+00> : vector<1xf32>
      %145 = vector.multi_reduction <add>, %144, %cst_93 [1, 2] : vector<1x8x128xf32> to vector<1xf32>
      %146 = vector.shape_cast %145 : vector<1xf32> to vector<1x1x1xf32>
      %147 = vector.extract %146[0, 0, 0] : f32 from vector<1x1x1xf32>
      %c0_94 = arith.constant 0 : index
      %c0_95 = arith.constant 0 : index
      %c2_96 = arith.constant 2 : index
      %148 = memref.load %arg7[%c0_94, %c0_95, %c2_96] : memref<1x1x10xf32, #tpu.memory_space<smem>>
      memref.store %147, %arg7[%c0_94, %c0_95, %c2_96] : memref<1x1x10xf32, #tpu.memory_space<smem>>
      %c3_97 = arith.constant 3 : index
      %c0_98 = arith.constant 0 : index
      %c0_99 = arith.constant 0 : index
      %149 = vector.load %arg8[%c3_97, %c0_98, %c0_99] : memref<10x8x128xf32, #tpu.memory_space<vmem>>, vector<1x8x128xf32>
      %150 = vector.shape_cast %149 : vector<1x8x128xf32> to vector<8x128xf32>
      %151 = vector.shape_cast %150 : vector<8x128xf32> to vector<1x8x128xf32>
      %cst_100 = arith.constant dense<0.000000e+00> : vector<1xf32>
      %152 = vector.multi_reduction <add>, %151, %cst_100 [1, 2] : vector<1x8x128xf32> to vector<1xf32>
      %153 = vector.shape_cast %152 : vector<1xf32> to vector<1x1x1xf32>
      %154 = vector.extract %153[0, 0, 0] : f32 from vector<1x1x1xf32>
      %c0_101 = arith.constant 0 : index
      %c0_102 = arith.constant 0 : index
      %c3_103 = arith.constant 3 : index
      %155 = memref.load %arg7[%c0_101, %c0_102, %c3_103] : memref<1x1x10xf32, #tpu.memory_space<smem>>
      memref.store %154, %arg7[%c0_101, %c0_102, %c3_103] : memref<1x1x10xf32, #tpu.memory_space<smem>>
      %c4_104 = arith.constant 4 : index
      %c0_105 = arith.constant 0 : index
      %c0_106 = arith.constant 0 : index
      %156 = vector.load %arg8[%c4_104, %c0_105, %c0_106] : memref<10x8x128xf32, #tpu.memory_space<vmem>>, vector<1x8x128xf32>
      %157 = vector.shape_cast %156 : vector<1x8x128xf32> to vector<8x128xf32>
      %158 = vector.shape_cast %157 : vector<8x128xf32> to vector<1x8x128xf32>
      %cst_107 = arith.constant dense<0.000000e+00> : vector<1xf32>
      %159 = vector.multi_reduction <add>, %158, %cst_107 [1, 2] : vector<1x8x128xf32> to vector<1xf32>
      %160 = vector.shape_cast %159 : vector<1xf32> to vector<1x1x1xf32>
      %161 = vector.extract %160[0, 0, 0] : f32 from vector<1x1x1xf32>
      %c0_108 = arith.constant 0 : index
      %c0_109 = arith.constant 0 : index
      %c4_110 = arith.constant 4 : index
      %162 = memref.load %arg7[%c0_108, %c0_109, %c4_110] : memref<1x1x10xf32, #tpu.memory_space<smem>>
      memref.store %161, %arg7[%c0_108, %c0_109, %c4_110] : memref<1x1x10xf32, #tpu.memory_space<smem>>
      %c5_111 = arith.constant 5 : index
      %c0_112 = arith.constant 0 : index
      %c0_113 = arith.constant 0 : index
      %163 = vector.load %arg8[%c5_111, %c0_112, %c0_113] : memref<10x8x128xf32, #tpu.memory_space<vmem>>, vector<1x8x128xf32>
      %164 = vector.shape_cast %163 : vector<1x8x128xf32> to vector<8x128xf32>
      %165 = vector.shape_cast %164 : vector<8x128xf32> to vector<1x8x128xf32>
      %cst_114 = arith.constant dense<0.000000e+00> : vector<1xf32>
      %166 = vector.multi_reduction <add>, %165, %cst_114 [1, 2] : vector<1x8x128xf32> to vector<1xf32>
      %167 = vector.shape_cast %166 : vector<1xf32> to vector<1x1x1xf32>
      %168 = vector.extract %167[0, 0, 0] : f32 from vector<1x1x1xf32>
      %c0_115 = arith.constant 0 : index
      %c0_116 = arith.constant 0 : index
      %c5_117 = arith.constant 5 : index
      %169 = memref.load %arg7[%c0_115, %c0_116, %c5_117] : memref<1x1x10xf32, #tpu.memory_space<smem>>
      memref.store %168, %arg7[%c0_115, %c0_116, %c5_117] : memref<1x1x10xf32, #tpu.memory_space<smem>>
      %c6_118 = arith.constant 6 : index
      %c0_119 = arith.constant 0 : index
      %c0_120 = arith.constant 0 : index
      %170 = vector.load %arg8[%c6_118, %c0_119, %c0_120] : memref<10x8x128xf32, #tpu.memory_space<vmem>>, vector<1x8x128xf32>
      %171 = vector.shape_cast %170 : vector<1x8x128xf32> to vector<8x128xf32>
      %172 = vector.shape_cast %171 : vector<8x128xf32> to vector<1x8x128xf32>
      %cst_121 = arith.constant dense<0.000000e+00> : vector<1xf32>
      %173 = vector.multi_reduction <add>, %172, %cst_121 [1, 2] : vector<1x8x128xf32> to vector<1xf32>
      %174 = vector.shape_cast %173 : vector<1xf32> to vector<1x1x1xf32>
      %175 = vector.extract %174[0, 0, 0] : f32 from vector<1x1x1xf32>
      %c0_122 = arith.constant 0 : index
      %c0_123 = arith.constant 0 : index
      %c6_124 = arith.constant 6 : index
      %176 = memref.load %arg7[%c0_122, %c0_123, %c6_124] : memref<1x1x10xf32, #tpu.memory_space<smem>>
      memref.store %175, %arg7[%c0_122, %c0_123, %c6_124] : memref<1x1x10xf32, #tpu.memory_space<smem>>
      %c7_125 = arith.constant 7 : index
      %c0_126 = arith.constant 0 : index
      %c0_127 = arith.constant 0 : index
      %177 = vector.load %arg8[%c7_125, %c0_126, %c0_127] : memref<10x8x128xf32, #tpu.memory_space<vmem>>, vector<1x8x128xf32>
      %178 = vector.shape_cast %177 : vector<1x8x128xf32> to vector<8x128xf32>
      %179 = vector.shape_cast %178 : vector<8x128xf32> to vector<1x8x128xf32>
      %cst_128 = arith.constant dense<0.000000e+00> : vector<1xf32>
      %180 = vector.multi_reduction <add>, %179, %cst_128 [1, 2] : vector<1x8x128xf32> to vector<1xf32>
      %181 = vector.shape_cast %180 : vector<1xf32> to vector<1x1x1xf32>
      %182 = vector.extract %181[0, 0, 0] : f32 from vector<1x1x1xf32>
      %c0_129 = arith.constant 0 : index
      %c0_130 = arith.constant 0 : index
      %c7_131 = arith.constant 7 : index
      %183 = memref.load %arg7[%c0_129, %c0_130, %c7_131] : memref<1x1x10xf32, #tpu.memory_space<smem>>
      memref.store %182, %arg7[%c0_129, %c0_130, %c7_131] : memref<1x1x10xf32, #tpu.memory_space<smem>>
      %c8_132 = arith.constant 8 : index
      %c0_133 = arith.constant 0 : index
      %c0_134 = arith.constant 0 : index
      %184 = vector.load %arg8[%c8_132, %c0_133, %c0_134] : memref<10x8x128xf32, #tpu.memory_space<vmem>>, vector<1x8x128xf32>
      %185 = vector.shape_cast %184 : vector<1x8x128xf32> to vector<8x128xf32>
      %186 = vector.shape_cast %185 : vector<8x128xf32> to vector<1x8x128xf32>
      %cst_135 = arith.constant dense<0.000000e+00> : vector<1xf32>
      %187 = vector.multi_reduction <add>, %186, %cst_135 [1, 2] : vector<1x8x128xf32> to vector<1xf32>
      %188 = vector.shape_cast %187 : vector<1xf32> to vector<1x1x1xf32>
      %189 = vector.extract %188[0, 0, 0] : f32 from vector<1x1x1xf32>
      %c0_136 = arith.constant 0 : index
      %c0_137 = arith.constant 0 : index
      %c8_138 = arith.constant 8 : index
      %190 = memref.load %arg7[%c0_136, %c0_137, %c8_138] : memref<1x1x10xf32, #tpu.memory_space<smem>>
      memref.store %189, %arg7[%c0_136, %c0_137, %c8_138] : memref<1x1x10xf32, #tpu.memory_space<smem>>
      %c9_139 = arith.constant 9 : index
      %c0_140 = arith.constant 0 : index
      %c0_141 = arith.constant 0 : index
      %191 = vector.load %arg8[%c9_139, %c0_140, %c0_141] : memref<10x8x128xf32, #tpu.memory_space<vmem>>, vector<1x8x128xf32>
      %192 = vector.shape_cast %191 : vector<1x8x128xf32> to vector<8x128xf32>
      %193 = vector.shape_cast %192 : vector<8x128xf32> to vector<1x8x128xf32>
      %cst_142 = arith.constant dense<0.000000e+00> : vector<1xf32>
      %194 = vector.multi_reduction <add>, %193, %cst_142 [1, 2] : vector<1x8x128xf32> to vector<1xf32>
      %195 = vector.shape_cast %194 : vector<1xf32> to vector<1x1x1xf32>
      %196 = vector.extract %195[0, 0, 0] : f32 from vector<1x1x1xf32>
      %c0_143 = arith.constant 0 : index
      %c0_144 = arith.constant 0 : index
      %c9_145 = arith.constant 9 : index
      %197 = memref.load %arg7[%c0_143, %c0_144, %c9_145] : memref<1x1x10xf32, #tpu.memory_space<smem>>
      memref.store %196, %arg7[%c0_143, %c0_144, %c9_145] : memref<1x1x10xf32, #tpu.memory_space<smem>>
    } else {
    }
    return
  }
  func.func @transform_0(%arg0: i32, %arg1: i32, %arg2: i32) -> (i32, i32, i32) {
    %c1_i32 = arith.constant 1 : i32
    %0 = arith.muli %arg1, %c1_i32 : i32
    %1 = arith.addi %0, %arg2 : i32
    %c0_i32 = arith.constant 0 : i32
    %c0_i32_0 = arith.constant 0 : i32
    return %arg0, %1, %c0_i32 : i32, i32, i32
  }
  func.func @transform_1(%arg0: i32, %arg1: i32, %arg2: i32) -> (i32, i32, i32) {
    %c1_i32 = arith.constant 1 : i32
    %0 = arith.muli %arg1, %c1_i32 : i32
    %1 = arith.addi %0, %arg2 : i32
    %c0_i32 = arith.constant 0 : i32
    %c0_i32_0 = arith.constant 0 : i32
    return %arg0, %1, %c0_i32 : i32, i32, i32
  }
  func.func @transform_2(%arg0: i32, %arg1: i32, %arg2: i32) -> (i32, i32, i32) {
    %c1_i32 = arith.constant 1 : i32
    %0 = arith.muli %arg1, %c1_i32 : i32
    %1 = arith.addi %0, %arg2 : i32
    %c0_i32 = arith.constant 0 : i32
    %c0_i32_0 = arith.constant 0 : i32
    return %arg0, %1, %c0_i32 : i32, i32, i32
  }
  func.func @transform_3(%arg0: i32, %arg1: i32, %arg2: i32) -> (i32, i32, i32) {
    %c1_i32 = arith.constant 1 : i32
    %0 = arith.muli %arg1, %c1_i32 : i32
    %1 = arith.addi %0, %arg2 : i32
    %c0_i32 = arith.constant 0 : i32
    %c0_i32_0 = arith.constant 0 : i32
    return %arg0, %1, %c0_i32 : i32, i32, i32
  }
  func.func @transform_4(%arg0: i32, %arg1: i32, %arg2: i32) -> (i32, i32, i32) {
    %c0_i32 = arith.constant 0 : i32
    %c0_i32_0 = arith.constant 0 : i32
    return %arg0, %arg1, %c0_i32 : i32, i32, i32
  }
}

</mosaic_0001>

<bundles_post_ra>
// kernel: tpu_custom_call.1
= control target key start
LH: loop header
LB: loop body
LE: loop exit
PB: predicated region body
PF: predicated region fallthrough
CT: control target
= control target key end

     0   :  { %s1394_s0 = inlined_call_operand.hbm [shape: f32[2,8,128], index: 0, kind: input, shape index: {}]   ;;  %s1395_s1 = inlined_call_operand.hbm [shape: f32[2,8,128], index: 1, kind: input, shape index: {}]   ;;  %s1396_s2 = inlined_call_operand.hbm [shape: f32[2,8,128], index: 2, kind: input, shape index: {}]   ;;  %s1397_s3 = inlined_call_operand.hbm [shape: f32[2,8,128], index: 3, kind: input, shape index: {}]   ;;  %s1398_s4 = inlined_call_operand.hbm [shape: f32[2,1,10], index: 4, kind: output, shape index: {}]  }
   0x1   :  { %1403 = sst [smem:[#allocation20_spill]] %s1395_s1 }
   0x2   :  { %9 = vsyncpa [#allocation4], 0 }
   0x3   :  { %11 = vsyncpa [#allocation4 + $0x1], 0 }
   0x4   :  { %12 = vsyncpa [#allocation7], 0 }
   0x5   :  { %14 = vsyncpa [#allocation7 + $0x1], 0 }
   0x6   :  { %15 = vsyncpa [#allocation10], 0 }
   0x7   :  { %17 = vsyncpa [#allocation10 + $0x1], 0 }
   0x8   :  { %18 = vsyncpa [#allocation5], 0 }
   0x9   :  { %20 = vsyncpa [#allocation5 + $0x1], 0  ;;  %s1138_s15 = smov 0   ;;  %s1140_s16 = smov 0  }
   0xa   :  { %s1142_s17 = smov 0   ;;  %s1144_s18 = smov 0  }
   0xb   :  { %s1146_s19 = smov 0   ;;  %s1148_s20 = smov 0  }
   0xc LB: > { %1404 = sst [smem:[#allocation16_spill]] %s1095_s17  ;;  %s1169_s21 = sadd.s32 4294967295, %s1107_s20   ;;  %s1107_s20 = sphi %s1148_s20, %s26_s20   ;;  %s1103_s19 = sphi %s1146_s19, %s1423_s19   ;;  %s1099_s18 = sphi %s1144_s18, %s1422_s18   ;;  %s1095_s17 = sphi %s1142_s17, %s1421_s17   ;;  %s1091_s16 = sphi %s1140_s16, %s1425_s16   ;;  %s1087_s15 = sphi %s1138_s15, %s1424_s15  }
   0xd   : > { %1405 = sst [smem:[#allocation17_spill]] %s1103_s19  ;;  %s790_s22 = sadd.s32 4294967294, %s1107_s20  }
   0xe   : > { %s45_s23 = sadd.s32 1, %s1103_s19  ;;  %s56_s24 = sadd.s32 1, %s1095_s17 }
   0xf   : > { %p47_p0 = scmp.ge.s32.totalorder %s45_s23, 2  ;;  %p63_p1 = scmp.ne.s32.totalorder %s1095_s17, %s1091_s16 }
  0x10   : > { %p64_p2 = scmp.eq.s32.totalorder %s1107_s20, 0  ;;  %p69_p3 = scmp.ne.s32.totalorder %s1091_s16, %s1087_s15 }
  0x11   : > { %s1427_s23 = smov (%p47_p0, %s45_s23), 0  ;;  %p70_p5 = scmp.eq.s32.totalorder %s1169_s21, 0 }
  0x12   : > { %1406 = sst [smem:[#allocation18_spill]] %s1427_s23  ;;  %p1181_p4 = por %p64_p2, %p63_p1 }
  0x13   : > { %s51_s26 = ssub.s32 %s1103_s19, %s1427_s23  ;;  %p185_p6 = scmp.eq.s32.totalorder %s1169_s21, 1 }
  0x14   : > { %p54_p7 = scmp.eq.s32.totalorder %s51_s26, 0  ;;  %p1189_p8 = por %p70_p5, %p69_p3 }
  0x15   : > { %p1193_p9 = por %p185_p6, %p63_p1  ;;  %p191_p10 = scmp.eq.s32.totalorder %s790_s22, 1 }
  0x16   : > { %s1198_s29 = scalar_select %p54_p7, %s1095_s17, %s56_s24  }
  0x17   : > { %p1200_p11 = por %p191_p10, %p69_p3  ;;  %p1399_p12 = scmp.lt.s32.totalorder %s1107_s20, 2 }
  0x18   : > { %1410 = sst [smem:[#allocation19_spill]] %s1198_s29  ;;  %s1206_s5 = sand.u32 1, %s1095_s17  }
  0x19   : > { %s1209_s6 = sshll.u32 %s1206_s5, 3  ;;  %s1212_s7 = sshll.u32 %s1103_s19, 7 }
  0x1a   : > { %p1218_p13 = pnand %p1399_p12, %p1181_p4  ;;  %s231_s9 = sand.u32 1, %s1107_s20  }
  0x1b   : > { %s1413_s1 = sld [smem:[#allocation20_spill]]  ;;  %s235_s13 = scalar_lea.vmem [#allocation6], %s1209_s6 }
  0x1c   : > { %s244_s14 = sshll.u32 %s235_s13, 4  ;;  %p801_p0 = scmp.ge.s32.totalorder %s1107_s20, 1  ;;  %s245_s14 = int_to_ptr.vmem [resolvable:$true] %s244_s14 }
  0x1d   : > { %p289_p1 = scmp.lt.s32.totalorder %s1107_s20, 3  ;;  %s1230_s22 = scalar_lea.sflag [#allocation7], %s231_s9 }
  0x1e   : > { %p923_p2 = pneg %p1218_p13  ;;  %s934_s24 = scalar_lea.vmem %s245_s14, 128 }
  0x1f   : > { %p935_p3 = scmp.ne.s32.totalorder %s245_s14, %s934_s24  ;;  %s1109_s25 = smov [#allocation6]  }
  0x20   : > { %s939_s26 = sshll.u32 %s1109_s25, 4  ;;  %s940_s26 = int_to_ptr.vmem [resolvable:$false] %s939_s26 }
  0x21   : > { %s242_s12 = scalar_lea.hbm %s1413_s1, %s1212_s7  ;;  %p937_p4 = pnand %p935_p3, %p923_p2 }
  0x22   : > { %s941_s10 = scalar_lea.vmem %s940_s26, 256  ;;  %p942_p6 = scmp.lt.s32.totalorder %s245_s14, %s940_s26 }
  0x23   : > { %p938_p5 = pneg %p937_p4  ;;  %p943_p7 = scmp.lt.s32.totalorder %s941_s10, %s934_s24 }
  0x25   : > { %p944_p10 = por %p943_p7, %p942_p6 }
  0x27   : > { %p945_p12 = pnand %p944_p10, %p938_p5 }
  0x29   : > { %948 = shalt.err (!%p945_p12)
}
  0x2a   : > { %847 = dma.hbm_to_vmem [thread:$0]  (!%p1218_p13), %s242_s12, 128, %s245_s14, %s1230_s22  }
  0x2b   : > { %p1244_p3 = pnand %p801_p0, %p289_p1  ;;  %s222_s24 = scalar_lea.hbm %s1394_s0, %s1212_s7 }
  0x2c   : > { %s215_s25 = scalar_lea.vmem [#allocation3], %s1209_s6  ;;  %s262_s23 = scalar_lea.hbm %s1396_s2, %s1212_s7 }
  0x2d   : > { %s224_s26 = sshll.u32 %s215_s25, 4  ;;  %s212_s19 = scalar_lea.sflag [#allocation4], %s1206_s5  ;;  %s225_s26 = int_to_ptr.vmem [resolvable:$true] %s224_s26 }
  0x2e   : > { %s962_s29 = scalar_lea.vmem %s225_s26, 128  ;;  %s1110_s12 = smov [#allocation3]  }
  0x2f   : > { %p963_p12 = scmp.ne.s32.totalorder %s225_s26, %s962_s29  ;;  %s967_s14 = sshll.u32 %s1110_s12, 4  ;;  %s968_s14 = int_to_ptr.vmem [resolvable:$false] %s967_s14 }
  0x30   : > { %s969_s17 = scalar_lea.vmem %s968_s14, 256  ;;  %p970_p4 = scmp.lt.s32.totalorder %s225_s26, %s968_s14 }
  0x31   : > { %p965_p0 = pnand %p963_p12, %p923_p2  ;;  %p971_p5 = scmp.lt.s32.totalorder %s969_s17, %s962_s29 }
  0x33   : > { %p966_p1 = pneg %p965_p0  ;;  %p972_p6 = por %p971_p5, %p970_p4 }
  0x35   : > { %p973_p7 = pnand %p972_p6, %p966_p1 }
  0x37   : > { %976 = shalt.err (!%p973_p7)
}
  0x38   : > { %844 = dma.hbm_to_vmem [thread:$0]  (!%p1218_p13), %s222_s24, 128, %s225_s26, %s212_s19  }
  0x39   : > { %s255_s1 = scalar_lea.vmem [#allocation8], %s1209_s6  ;;  %s1111_s25 = smov [#allocation8]  }
  0x3a   : > { %s264_s11 = sshll.u32 %s255_s1, 4  ;;  %s995_s10 = sshll.u32 %s1111_s25, 4  ;;  %s265_s11 = int_to_ptr.vmem [resolvable:$true] %s264_s11  ;;  %s996_s10 = int_to_ptr.vmem [resolvable:$false] %s995_s10 }
  0x3b   : > { %s990_s13 = scalar_lea.vmem %s265_s11, 128  ;;  %s997_s17 = scalar_lea.vmem %s996_s10, 256 }
  0x3c   : > { %p991_p10 = scmp.ne.s32.totalorder %s265_s11, %s990_s13  ;;  %p998_p1 = scmp.lt.s32.totalorder %s265_s11, %s996_s10 }
  0x3d   : > { %p999_p4 = scmp.lt.s32.totalorder %s997_s17, %s990_s13 }
  0x3e   : > { %p993_p12 = pnand %p991_p10, %p923_p2 }
  0x3f   : > { %p1000_p5 = por %p999_p4, %p998_p1 }
  0x40   : > { %p994_p0 = pneg %p993_p12 }
  0x42   : > { %p1001_p6 = pnand %p1000_p5, %p994_p0 }
  0x44   : > { %1004 = shalt.err (!%p1001_p6)
}
  0x45   : > { %850 = dma.hbm_to_vmem [thread:$0]  (!%p1218_p13), %s262_s23, 128, %s265_s11, %s1230_s22  }
  0x46   : > { %s282_s12 = scalar_lea.hbm %s1397_s3, %s1212_s7  ;;  %s275_s14 = scalar_lea.vmem [#allocation9], %s1209_s6 }
  0x47   : > { %s284_s1 = sshll.u32 %s275_s14, 4  ;;  %s272_s13 = scalar_lea.sflag [#allocation10], %s1206_s5  ;;  %s285_s1 = int_to_ptr.vmem [resolvable:$true] %s284_s1 }
  0x48   : > { %s1018_s25 = scalar_lea.vmem %s285_s1, 128  ;;  %s1112_s10 = smov [#allocation9]  }
  0x49   : > { %p1019_p7 = scmp.ne.s32.totalorder %s285_s1, %s1018_s25  ;;  %s1023_s17 = sshll.u32 %s1112_s10, 4  ;;  %s1024_s17 = int_to_ptr.vmem [resolvable:$false] %s1023_s17 }
  0x4a   : > { %s1025_s19 = scalar_lea.vmem %s1024_s17, 256  ;;  %p1026_p0 = scmp.lt.s32.totalorder %s285_s1, %s1024_s17 }
  0x4b   : > { %p1021_p10 = pnand %p1019_p7, %p923_p2  ;;  %p1027_p1 = scmp.lt.s32.totalorder %s1025_s19, %s1018_s25 }
  0x4d   : > { %p1022_p12 = pneg %p1021_p10  ;;  %p1028_p4 = por %p1027_p1, %p1026_p0 }
  0x4f   : > { %p1029_p5 = pnand %p1028_p4, %p1022_p12 }
  0x51   : > { %1032 = shalt.err (!%p1029_p5)
}
  0x52   : > { %853 = dma.hbm_to_vmem [thread:$0]  (!%p1218_p13), %s282_s12, 128, %s285_s1, %s272_s13  }
  0x53   : > { %293 = sbr.rel (%p1244_p3) target bundleno = 361 (0x169), region = 36  ;;  %s1289_s23 = sand.u32 (!%p1244_p3), 1, %s1091_s16  }
  0x54   : > { %s1292_s5 = sshll.u32 (!%p1244_p3), %s1289_s23, 3  ;;  %s296_s6 = scalar_lea.sflag (!%p1244_p3), [#allocation4], %s1289_s23 }
  0x55   : > { %s299_s7 = scalar_lea.vmem (!%p1244_p3), [#allocation3], %s1292_s5 }
  0x58   : > { %1070 = dma.done.wait (%p1189_p8), %s296_s6, 128  }
  0x59   : > { %1072 = vsyncadd (%p1189_p8), %s296_s6, 4294967168  ;;  %s304_s8 = sand.u32 1, %s1169_s21   ;;  %s308_s9 = scalar_lea.vmem [#allocation6], %s1292_s5 }
  0x5a   : > { %s305_s22 = scalar_lea.sflag [#allocation7], %s304_s8 }
  0x5b   : > { %1074 = dma.done.wait (%p1189_p8), %s305_s22, 256  }
  0x5c   : > { %1076 = vsyncadd (%p1189_p8), %s305_s22, 4294967040  ;;  %s317_s11 = scalar_lea.vmem [#allocation8], %s1292_s5  ;;  %s323_s29 = scalar_lea.sflag [#allocation10], %s1289_s23 }
  0x5d   : > { %s326_s24 = scalar_lea.vmem [#allocation9], %s1292_s5 }
  0x5e   : > { %1078 = dma.done.wait (%p1189_p8), %s323_s29, 128  }
  0x5f   : > { %1080 = vsyncadd (%p1189_p8), %s323_s29, 4294967168  ;;  %v389_v0 = vld [vmem:[%s299_s7] sm:$0xff]  ;;  %v1313_v1 = vld [vmem:[%s308_s9] sm:$0xff]  ;;  %s806_s21 = sshll.u32 %s1289_s23, 7  ;;  %s808_s9 = sshll.u32 %s1099_s18, 4 }
  0x60   : > { %v390_v2 = vand.u32 2147483647, %v389_v0  ;;  %v1315_v3 = vld [vmem:[%s317_s11] sm:$0xff]  ;;  %v425_v4 = vand.u32 2147483647, %v1313_v1  ;;  %v384_v19 = vld [vmem:[%s326_s24] sm:$0xff] }
  0x61   : > { %v461_v6 = vand.u32 2147483647, %v1315_v3  ;;  %v394_v22 = vmax.f32 %v389_v0, 0.0  ;;  %v395_v23 = vmul.f32 %v389_v0, %v384_v19  ;;  %vm409_vm0 = vcmp.ge.f32.partialorder %v389_v0, 0.0  ;;  %s1341_s26 = scalar_lea.smem [#allocation11], %s806_s21 }
  0x62   : > { %v391_v5 = vsub.f32 0.0, %v390_v2  ;;  %v426_v7 = vsub.f32 0.0, %v425_v4  ;;  %v429_v29 = vmax.f32 %v1313_v1, 0.0  ;;  %v430_v30 = vmul.f32 %v1313_v1, %v384_v19  ;;  %s521_s12 = scalar_lea.smem %s1341_s26, 1 [#allocation11]  ;;  %s533_s14 = scalar_lea.smem %s1341_s26, 2 [#allocation11] }
  0x63   : > { %v462_v9 = vsub.f32 0.0, %v461_v6  ;;  %v396_v34 = vsub.f32 %v394_v22, %v395_v23  ;;  %vm444_vm2 = vcmp.ge.f32.partialorder %v1313_v1, 0.0  ;;  %vm480_vm4 = vcmp.ge.f32.partialorder %v1315_v3, 0.0  ;;  %s545_s1 = scalar_lea.smem %s1341_s26, 3 [#allocation11]  ;;  %s557_s25 = scalar_lea.smem %s1341_s26, 4 [#allocation11] }
  0x64   : > { %v392_v8 = vmul.f32 1.442695, %v391_v5  ;;  %v427_v10 = vmul.f32 1.442695, %v426_v7  ;;  %v431_v45 = vsub.f32 %v429_v29, %v430_v30  ;;  %v465_v55 = vmax.f32 %v1315_v3, 0.0  ;;  %s569_s19 = scalar_lea.smem %s1341_s26, 5 [#allocation11] }
  0x65   : > { %v463_v11 = vmul.f32 1.442695, %v462_v9  ;;  %v466_v56 = vmul.f32 %v1315_v3, %v384_v19  ;;  %s581_s7 = scalar_lea.smem %s1341_s26, 6 [#allocation11]  ;;  %s593_s8 = scalar_lea.smem %s1341_s26, 7 [#allocation11] }
  0x66   : > { %903 = vpow2.f32 %v392_v8  ;;  %s605_s29 = scalar_lea.smem %s1341_s26, 8 [#allocation11]  ;;  %s617_s24 = scalar_lea.smem %s1341_s26, 9 [#allocation11] }
  0x67   : > { %905 = vpow2.f32 %v427_v10  ;;  %v467_v62 = vsub.f32 %v465_v55, %v466_v56 }
  0x68   : > { %907 = vpow2.f32 %v463_v11 }
  0x73   : > { %v904_v12 = vpop.eup %903 }
  0x74   : > { %v906_v13 = vpop.eup %905  ;;  %v397_v14 = vadd.f32 1.0, %v904_v12  ;;  %v400_v18 = vmul.f32 -0.5, %v904_v12  ;;  %v403_v24 = vand.u32 2147483647, %v904_v12 }
  0x75   : > { %v908_v15 = vpop.eup %907  ;;  %v432_v16 = vadd.f32 1.0, %v906_v13  ;;  %v435_v20 = vmul.f32 -0.5, %v906_v13  ;;  %v438_v26 = vand.u32 2147483647, %v906_v13 }
  0x76   : > { %909 = vrcp.f32 %v397_v14  ;;  %v468_v17 = vadd.f32 1.0, %v908_v15  ;;  %v401_v21 = vadd.f32 1.0, %v400_v18  ;;  %v471_v31 = vmul.f32 -0.5, %v908_v15 }
  0x77   : > { %911 = vlog2.f32 %v397_v14  ;;  %v436_v25 = vadd.f32 1.0, %v435_v20  ;;  %vm1323_vm1 = vcmp.lt.f32.partialorder %v403_v24, 0.0004427343  ;;  %vm1329_vm3 = vcmp.lt.f32.partialorder %v438_v26, 0.0004427343 }
  0x78   : > { %913 = vrcp.f32 %v432_v16  ;;  %v402_v28 = vmul.f32 %v904_v12, %v401_v21  ;;  %v472_v47 = vadd.f32 1.0, %v471_v31  ;;  %v474_v52 = vand.u32 2147483647, %v908_v15 }
  0x79   : > { %915 = vlog2.f32 %v432_v16  ;;  %v437_v38 = vmul.f32 %v906_v13, %v436_v25 }
  0x7a   : > { %917 = vrcp.f32 %v468_v17  ;;  %v473_v59 = vmul.f32 %v908_v15, %v472_v47  ;;  %vm475_vm5 = vcmp.lt.f32.partialorder %v474_v52, 0.0004427343 }
  0x7b   : > { %919 = vlog2.f32 %v468_v17 }
  0x83   : > { %v910_v27 = vpop.eup %909 }
  0x84   : > { %v912_v32 = vpop.eup %911  ;;  %v410_v33 = vmul.f32 %v910_v27, %v904_v12 }
  0x85   : > { %v914_v36 = vpop.eup %913  ;;  %v399_v37 = vmul.f32 0.6931472, %v912_v32 }
  0x86   : > { %v916_v39 = vpop.eup %915  ;;  %v411_v40 = vsel %vm409_vm0, %v910_v27, %v410_v33  ;;  %v445_v41 = vmul.f32 %v914_v36, %v906_v13 }
  0x87   : > { %v918_v43 = vpop.eup %917  ;;  %524 = vadd.xlane.f32.xlu1 %v411_v40  ;;  %v405_v44 = vsel %vm1323_vm1, %v402_v28, %v399_v37  ;;  %v434_v46 = vmul.f32 0.6931472, %v916_v39  ;;  %v417_v54 = vmul.f32 %v411_v40, %v384_v19 }
  0x88   : > { %v920_v48 = vpop.eup %919  ;;  %v406_v49 = vadd.f32 %v405_v44, %v396_v34  ;;  %v446_v50 = vsel %vm444_vm2, %v914_v36, %v445_v41  ;;  %v481_v51 = vmul.f32 %v918_v43, %v908_v15 }
  0x89   : > { %v440_v53 = vsel %vm1329_vm3, %v437_v38, %v434_v46  ;;  %v470_v58 = vmul.f32 0.6931472, %v920_v48  ;;  %v453_v61 = vmul.f32 %v446_v50, %v384_v19 }
  0x8a   : > { %500 = vadd.xlane.f32.xlu0 %v406_v49  ;;  %v441_v57 = vadd.f32 %v440_v53, %v431_v45  ;;  %v482_v60 = vsel %vm480_vm4, %v918_v43, %v481_v51 }
  0x8b   : > { %560 = vadd.xlane.f32.xlu1 %v446_v50  ;;  %v489_v63 = vmul.f32 %v482_v60, %v384_v19  ;;  %v476_v0 = vsel %vm475_vm5, %v473_v59, %v470_v58 }
  0x8c   : > { %v477_v1 = vadd.f32 %v476_v0, %v467_v62 }
  0x8e   : > { %512 = vadd.xlane.f32.xlu0 %v417_v54 }
  0x8f   : > { %536 = vadd.xlane.f32.xlu1 %v441_v57 }
  0x92   : > { %548 = vadd.xlane.f32.xlu0 %v453_v61 }
  0x93   : > { %584 = vadd.xlane.f32.xlu1 %v489_v63 }
  0x96   : > { %572 = vadd.xlane.f32.xlu0 %v477_v1 }
  0x97   : > { %608 = vadd.xlane.f32.xlu1 %v384_v19 }
  0x9a   : > { %596 = vadd.xlane.f32.xlu0 %v482_v60 }
 0x110   : > { %v525_v2 = vpop.xlane.xlu1 %524 }
 0x111   : > { %v526_v3 = vrot.slane %v525_v2, 4 }
 0x113   : > { %v527_v4 = vadd.f32 %v526_v3, %v525_v2  ;;  %v501_v5 = vpop.xlane.xlu0 %500 }
 0x114   : > { %v502_v6 = vrot.slane %v501_v5, 4  ;;  %v561_v7 = vpop.xlane.xlu1 %560 }
 0x115   : > { %v562_v8 = vrot.slane %v561_v7, 4  ;;  %v528_v9 = vrot.slane %v527_v4, 2 }
 0x116   : > { %v503_v10 = vadd.f32 %v502_v6, %v501_v5 }
 0x117   : > { %v563_v11 = vadd.f32 %v562_v8, %v561_v7  ;;  %v513_v12 = vpop.xlane.xlu0 %512  ;;  %v529_v20 = vadd.f32 %v528_v9, %v527_v4 }
 0x118   : > { %v504_v13 = vrot.slane %v503_v10, 2  ;;  %v514_v14 = vrot.slane %v513_v12, 4  ;;  %v537_v15 = vpop.xlane.xlu1 %536 }
 0x119   : > { %v538_v16 = vrot.slane %v537_v15, 4  ;;  %v564_v19 = vrot.slane %v563_v11, 2  ;;  %v530_v32 = vrot.slane %v529_v20, 1 }
 0x11a   : > { %v515_v17 = vadd.f32 %v514_v14, %v513_v12  ;;  %v505_v18 = vadd.f32 %v504_v13, %v503_v10 }
 0x11b   : > { %v539_v21 = vadd.f32 %v538_v16, %v537_v15  ;;  %v549_v22 = vpop.xlane.xlu0 %548  ;;  %v565_v36 = vadd.f32 %v564_v19, %v563_v11  ;;  %v531_v46 = vadd.f32 %v530_v32, %v529_v20 }
 0x11c   : > { %v516_v23 = vrot.slane %v515_v17, 2  ;;  %v550_v24 = vrot.slane %v549_v22, 4  ;;  %v585_v25 = vpop.xlane.xlu1 %584  ;;  %v506_v26 = vrot.slane %v505_v18, 1 }
 0x11d   : > { %v540_v27 = vrot.slane %v539_v21, 2  ;;  %v586_v28 = vrot.slane %v585_v25, 4  ;;  %v566_v51 = vrot.slane %v565_v36, 1 }
 0x11e   : > { %v551_v29 = vadd.f32 %v550_v24, %v549_v22  ;;  %v507_v30 = vadd.f32 %v506_v26, %v505_v18  ;;  %v517_v31 = vadd.f32 %v516_v23, %v515_v17 }
 0x11f   : > { %v587_v33 = vadd.f32 %v586_v28, %v585_v25  ;;  %v573_v34 = vpop.xlane.xlu0 %572  ;;  %v541_v35 = vadd.f32 %v540_v27, %v539_v21  ;;  %v567_v61 = vadd.f32 %v566_v51, %v565_v36 }
 0x120   : > { %v552_v37 = vrot.slane %v551_v29, 2  ;;  %v574_v38 = vrot.slane %v573_v34, 4  ;;  %811 = vpush %v507_v30  ;;  %v609_v39 = vpop.xlane.xlu1 %608  ;;  %v518_v40 = vrot.slane %v517_v31, 1 }
 0x121   : > { %v588_v41 = vrot.slane %v587_v33, 2  ;;  %v610_v42 = vrot.slane %v609_v39, 4  ;;  %v542_v43 = vrot.slane %v541_v35, 1 }
 0x122   : > { %v575_v44 = vadd.f32 %v574_v38, %v573_v34  ;;  %v519_v45 = vadd.f32 %v518_v40, %v517_v31  ;;  %v553_v47 = vadd.f32 %v552_v37, %v551_v29 }
 0x123   : > { %v611_v48 = vadd.f32 %v610_v42, %v609_v39  ;;  %v597_v49 = vpop.xlane.xlu0 %596  ;;  %v543_v50 = vadd.f32 %v542_v43, %v541_v35  ;;  %v589_v52 = vadd.f32 %v588_v41, %v587_v33 }
 0x124   : > { %v576_v53 = vrot.slane %v575_v44, 2  ;;  %v598_v54 = vrot.slane %v597_v49, 4  ;;  %813 = vpush %v519_v45  ;;  %v554_v55 = vrot.slane %v553_v47, 1 }
 0x125   : > { %v612_v56 = vrot.slane %v611_v48, 2  ;;  %815 = vpush %v531_v46  ;;  %v590_v62 = vrot.slane %v589_v52, 1 }
 0x126   : > { %v599_v57 = vadd.f32 %v598_v54, %v597_v49  ;;  %817 = vpush %v543_v50  ;;  %v555_v58 = vadd.f32 %v554_v55, %v553_v47  ;;  %v577_v59 = vadd.f32 %v576_v53, %v575_v44 }
 0x127   : > { %v613_v60 = vadd.f32 %v612_v56, %v611_v48  ;;  %v591_v3 = vadd.f32 %v590_v62, %v589_v52 }
 0x128   : > { %v600_v63 = vrot.slane %v599_v57, 2  ;;  %819 = vpush %v555_v58  ;;  %v578_v0 = vrot.slane %v577_v59, 1 }
 0x129   : > { %821 = vpush %v567_v61  ;;  %v614_v4 = vrot.slane %v613_v60, 1 }
 0x12a   : > { %v601_v1 = vadd.f32 %v600_v63, %v599_v57  ;;  %v579_v2 = vadd.f32 %v578_v0, %v577_v59 }
 0x12b   : > { %v615_v7 = vadd.f32 %v614_v4, %v613_v60 }
 0x12c   : > { %823 = vpush %v579_v2  ;;  %v602_v5 = vrot.slane %v601_v1, 1 }
 0x12d   : > { %825 = vpush %v591_v3 }
 0x12e   : > { %v603_v6 = vadd.f32 %v602_v5, %v601_v1 }
 0x130   : > { %827 = vpush %v603_v6 }
 0x131   : > { %829 = vpush %v615_v7 }
 0x151   : > { %s812_s27 = spop %811 }
 0x152   : > { %510 = sst [smem:[%s1341_s26]] %s812_s27 }
 0x155   : > { %s814_s13 = spop %813 }
 0x156   : > { %522 = sst [smem:[%s521_s12]] %s814_s13  ;;  %s816_s10 = spop %815 }
 0x157   : > { %534 = sst [smem:[%s533_s14]] %s816_s10  ;;  %s818_s17 = spop %817 }
 0x158   : > { %546 = sst [smem:[%s545_s1]] %s818_s17  ;;  %s632_s14 = scalar_lea.hbm %s1398_s4, %s808_s9 }
 0x159   : > { %s820_s5 = spop %819  ;;  %s620_s13 = scalar_lea.sflag [#allocation5], %s1289_s23 }
 0x15a   : > { %558 = sst [smem:[%s557_s25]] %s820_s5  ;;  %s822_s6 = spop %821 }
 0x15b   : > { %570 = sst [smem:[%s569_s19]] %s822_s6  ;;  %s1033_s25 = scalar_lea.hbm %s632_s14, 16 }
 0x15c   : > { %p1034_p8 = scmp.ne.s32.totalorder %s632_s14, %s1033_s25  ;;  %s1037_s17 = scalar_lea.hbm %s1398_s4, 32 }
 0x15d   : > { %s824_s22 = spop %823  ;;  %p1038_p3 = scmp.lt.s32.totalorder %s632_s14, %s1398_s4 }
 0x15e   : > { %582 = sst [smem:[%s581_s7]] %s824_s22  ;;  %s826_s11 = spop %825 }
 0x15f   : > { %594 = sst [smem:[%s593_s8]] %s826_s11  ;;  %p1035_p13 = pnand %p1034_p8, %p1193_p9 }
 0x160   : > { %p1039_p6 = scmp.lt.s32.totalorder %s1037_s17, %s1033_s25 }
 0x161   : > { %s828_s21 = spop %827  ;;  %p1036_p2 = pneg %p1035_p13 }
 0x162   : > { %606 = sst [smem:[%s605_s29]] %s828_s21  ;;  %s830_s1 = spop %829 }
 0x163   : > { %618 = sst [smem:[%s617_s24]] %s830_s1  ;;  %p1040_p7 = por %p1039_p6, %p1038_p3 }
 0x165   : > { %p1041_p10 = pnand %p1040_p7, %p1036_p2 }
 0x167   : > { %1044 = shalt.err (!%p1041_p10)
}
 0x168   : > { %839 = dma.smem_to_hbm (%p1193_p9), %s1341_s26, 16, %s632_s14, %s620_s13  }
 0x169 PF: > { %p1419_p12 = scmp.lt.s32.totalorder %s1107_s20, 2 }
 0x16a   : > { %s644_s23 = sand.u32 (!%p1419_p12), 1, %s1087_s15  }
 0x16b   : > { %639 = sbr.rel (%p1419_p12) target bundleno = 371 (0x173), region = 68  ;;  %s645_s6 = scalar_lea.sflag (!%p1419_p12), [#allocation5], %s644_s23 }
 0x170   : > { %1082 = dma.done.wait (%p1200_p11), %s645_s6, 16  }
 0x171   : > { %1084 = vsyncadd (%p1200_p11), %s645_s6, 4294967280 }
 0x172   : > { %650 = sfence }
 0x173 PF: > { %s26_s20 = sadd.s32 1, %s1107_s20   ;;  %s1420_s28 = sld [smem:[#allocation16_spill]] }
 0x174   : > { %p23_p0 = scmp.ge.s32.totalorder %s26_s20, 4   ;;  %s1421_s17 = sld [smem:[#allocation19_spill]] }
 0x175   : > { %s1422_s18 = sld [smem:[#allocation17_spill]]  ;;  %s1424_s15 = smov %s1091_s16 }
 0x176   : > { %s1423_s19 = sld [smem:[#allocation18_spill]]  ;;  %25 = sbr.rel (!%p23_p0) target bundleno = 12 (0xc), region = 145 }
 0x179   : > { %s1425_s16 = smov %s1420_s28 }
 0x17b   :  { %651 = vsyncpa [#allocation4], 1 }
 0x17c   :  { %653 = vsyncpa [#allocation4 + $0x1], 1 }
 0x17d   :  { %654 = vsyncpa [#allocation7], 1 }
 0x17e   :  { %656 = vsyncpa [#allocation7 + $0x1], 1 }
 0x17f   :  { %657 = vsyncpa [#allocation10], 1 }
 0x180   :  { %659 = vsyncpa [#allocation10 + $0x1], 1 }
 0x181   :  { %660 = vsyncpa [#allocation5], 1 }
 0x182   :  { %662 = vsyncpa [#allocation5 + $0x1], 1 }

</bundles_post_ra>
